<compile_context>
chip_gen: v5e
topology: v5e:2x2
jax: 0.10.0
libtpu: 0.0.40
codegen_flags: <defaults>
</compile_context>

<pallas_src>
import functools

import jax
import jax.numpy as jnp
from jax.experimental import pallas as pl
from jax.experimental.pallas import tpu as pltpu

_MIB = 1024 * 1024


def _round_up(x: int, m: int) -> int:
    return ((x + m - 1) // m) * m


def _round_down(x: int, m: int) -> int:
    return (x // m) * m


def _vmem_capacity_bytes() -> int:
    try:
        return int(pltpu.get_tpu_info().vmem_capacity_bytes)
    except Exception:
        return 64 * _MIB  # conservative default (v7x per-TC VMEM)


def _is_v5() -> bool:
    try:
        kind = jax.devices()[0].device_kind.lower()
    except Exception:
        return False
    return "v5" in kind


def _padded_feature_dim(fdim: int):
    """Pad small non-128-multiple widths for lane-dense stores; leave
    128-multiples and large widths unpadded (masked tail vst is cheaper than
    padded HBM traffic + an output slice copy)."""
    if fdim % 128 == 0:
        return fdim, 0
    if fdim < 512:
        fdim_p = _round_up(fdim, 128)
        return fdim_p, fdim_p - fdim
    return fdim, 0


def prepare_film_params(weight, bias):
    """One-time prep of nn.Linear(context_dim, 2*feature_dim) params.

    Hoist this out of the per-step hot path: it pays an HBM transpose/pad of
    the (2*fdim, cdim) matrix exactly once.
    """
    two_f, cdim = weight.shape
    fdim = two_f // 2
    fdim_p, pad_f = _padded_feature_dim(fdim)
    wg = weight[:fdim, :].T          # (cdim, fdim) lane-dense gamma projection
    wb = weight[fdim:, :].T          # (cdim, fdim) lane-dense beta  projection
    bg = bias[:fdim]
    bb = bias[fdim:]
    if pad_f:
        wg = jnp.pad(wg, ((0, 0), (0, pad_f)))
        wb = jnp.pad(wb, ((0, 0), (0, pad_f)))
        bg = jnp.pad(bg, (0, pad_f))
        bb = jnp.pad(bb, (0, pad_f))
    return {
        "wg": wg,
        "wb": wb,
        "bg": bg.reshape(1, fdim_p),
        "bb": bb.reshape(1, fdim_p),
        "fdim": fdim,
        "fdim_p": fdim_p,
        "cdim": cdim,
    }


def _film_kernel(feature_ref, context_ref, wg_ref, wb_ref, bg_ref, bb_ref,
                 out_ref, *, compute_dtype):
    ctx = context_ref[...]
    # Two lane-aligned projections (MXU, f32 accumulate). K = cdim is tiny,
    # so the kernel stays HBM-bound; FMA runs in compute_dtype (f32, or bf16
    # on chips with a bf16 VPU when inputs are bf16).
    gamma = (jnp.dot(ctx, wg_ref[...], preferred_element_type=jnp.float32)
             + bg_ref[...].astype(jnp.float32)).astype(compute_dtype)
    beta = (jnp.dot(ctx, wb_ref[...], preferred_element_type=jnp.float32)
            + bb_ref[...].astype(jnp.float32)).astype(compute_dtype)
    out_ref[...] = (gamma * feature_ref[...].astype(compute_dtype)
                    + beta).astype(out_ref.dtype)


def film(feature, context, weight_or_params, bias=None, *, tb=None, tn=None):
    """FiLM forward.

    Args:
      feature: (B, feature_dim)
      context: (B, context_dim)
      weight_or_params: either the PyTorch-convention (2*feature_dim,
        context_dim) weight (with `bias` given), or the dict returned by
        `prepare_film_params` (preferred for hot loops).
      bias: (2*feature_dim,) if a raw weight was passed.
    Returns:
      (B, feature_dim) conditioned feature.
    """
    if bias is not None:
        params = prepare_film_params(weight_or_params, bias)
    else:
        params = weight_or_params

    wg, wb, bg, bb = params["wg"], params["wb"], params["bg"], params["bb"]
    fdim, fdim_p, cdim = params["fdim"], params["fdim_p"], params["cdim"]

    B, f_in = feature.shape
    assert f_in == fdim, (f_in, fdim)
    assert context.shape == (B, cdim), (context.shape, (B, cdim))

    vmem_cap = _vmem_capacity_bytes()
    small_vmem = vmem_cap <= 80 * _MIB   # v7x-class (64 MiB per TC)

    f_item = feature.dtype.itemsize
    c_item = context.dtype.itemsize
    w_item = wg.dtype.itemsize
    o_item = f_item

    # Compute dtype: bf16 FMA only where the VPU has bf16 (v6e/v7x).
    if feature.dtype == jnp.bfloat16 and not _is_v5():
        compute_dtype = jnp.bfloat16
    else:
        compute_dtype = jnp.float32
    comp_item = 2 if compute_dtype == jnp.bfloat16 else 4

    # ---- Feature (lane) tiling: bound resident weight VMEM. ----
    if tn is None:
        if fdim_p % 128 != 0:
            # Large non-128-multiple width: block last dim == full array dim.
            tn = fdim_p
        else:
            weight_budget = (8 if small_vmem else 16) * _MIB
            max_tn = _round_down(weight_budget // (4 * cdim * w_item), 128)
            tn = max(128, min(fdim_p, max_tn))
    nf = pl.cdiv(fdim_p, tn)

    # ---- Batch (sublane) tiling: size streamed tiles by bytes. ----
    if tb is None:
        target_tile_bytes = (4 if small_vmem else 8) * _MIB
        tb = target_tile_bytes // max(1, tn * f_item)
        tb = max(8, min(tb, 4096))
    tb = min(tb, _round_up(B, 8))
    tb = max(8, _round_down(tb, 8))
    nb = pl.cdiv(B, tb)

    # Feature axis outer, batch axis inner: each weight column tile stays
    # VMEM-resident across the whole inner batch sweep.
    grid = (nf, nb)

    # ---- Explicit VMEM budget: double-buffered streamed tiles + resident
    #      weights/biases + in-kernel temporaries (gamma, beta, cast). ----
    stream = 2 * (tb * tn * f_item + tb * tn * o_item + tb * cdim * c_item)
    resident = 2 * 2 * (cdim * tn + tn) * w_item
    temps = 3 * tb * tn * max(comp_item, 4)
    cap = min(vmem_cap * 3 // 4, 100 * _MIB)
    vmem_limit = int(min(cap, max(8 * _MIB, stream + resident + temps + 4 * _MIB)))

    cost = pl.CostEstimate(
        flops=4 * B * fdim_p * cdim + 3 * B * fdim_p,
        transcendentals=0,
        bytes_accessed=(B * fdim_p * (f_item + o_item) + B * cdim * c_item
                        + 2 * cdim * fdim_p * w_item + 2 * fdim_p * w_item),
    )

    out = pl.pallas_call(
        functools.partial(_film_kernel, compute_dtype=compute_dtype),
        out_shape=jax.ShapeDtypeStruct((B, fdim_p), feature.dtype),
        grid=grid,
        in_specs=[
            pl.BlockSpec((tb, tn), lambda j, i: (i, j)),     # feature  (streamed)
            pl.BlockSpec((tb, cdim), lambda j, i: (i, 0)),   # context  (streamed)
            pl.BlockSpec((cdim, tn), lambda j, i: (0, j)),   # W_gamma  (resident over inner loop)
            pl.BlockSpec((cdim, tn), lambda j, i: (0, j)),   # W_beta   (resident over inner loop)
            pl.BlockSpec((1, tn), lambda j, i: (0, j)),      # b_gamma  (resident over inner loop)
            pl.BlockSpec((1, tn), lambda j, i: (0, j)),      # b_beta   (resident over inner loop)
        ],
        out_specs=pl.BlockSpec((tb, tn), lambda j, i: (i, j)),
        compiler_params=pltpu.CompilerParams(
            dimension_semantics=("parallel", "parallel"),
            vmem_limit_bytes=vmem_limit,
        ),
        cost_estimate=cost,
    )(feature, context, wg, wb, bg, bb)

    if fdim_p != fdim:
        # Only the small-fdim pad path pays this slice; zero-padded weight/bias
        # columns guarantee the kept columns are exact.
        out = out[:, :fdim]
    return out


def film_reference(feature, context, weight, bias):
    proj = context @ weight.T + bias
    fdim = feature.shape[1]
    gamma, beta = proj[:, :fdim], proj[:, fdim:]
    return gamma * feature + beta


if __name__ == "__main__":
    feature_dim = 32
    context_dim = 16

    key = jax.random.PRNGKey(0)
    k_f, k_c, k_w, k_b = jax.random.split(key, 4)

    # Deterministic nn.Linear-style init: U(-1/sqrt(fan_in), 1/sqrt(fan_in)).
    bound = 1.0 / (context_dim ** 0.5)
    weight = jax.random.uniform(
        k_w, (2 * feature_dim, context_dim), minval=-bound, maxval=bound,
        dtype=jnp.float32,
    )
    bias = jax.random.uniform(
        k_b, (2 * feature_dim,), minval=-bound, maxval=bound, dtype=jnp.float32
    )

    # One-time parameter prep (hoisted out of the hot path).
    params = prepare_film_params(weight, bias)

    ok = True
    # Tile-aligned batch, then a non-aligned batch to exercise the masked
    # partial-block path (no wrapper padding anymore).
    for batch in (8, 10):
        feature = jax.random.normal(k_f, (batch, feature_dim), dtype=jnp.float32)
        context = jax.random.normal(k_c, (batch, context_dim), dtype=jnp.float32)

        out = film(feature, context, params)
        jax.block_until_ready(out)

        ref = film_reference(feature, context, weight, bias)
        ok = ok and (out.shape == (batch, feature_dim))
        ok = ok and bool(jnp.allclose(out, ref, atol=1e-5, rtol=1e-5))

    assert ok
    print("KERNEL_OK")
</pallas_src>

<mosaic_0001>
module attributes {stable_mosaic.version = 11 : i64} {
  func.func @_film_kernel(%arg0: i32, %arg1: i32, %arg2: memref<8x128xf32, #tpu.memory_space<vmem>>, %arg3: memref<8x16xf32, #tpu.memory_space<vmem>>, %arg4: memref<16x128xf32, #tpu.memory_space<vmem>>, %arg5: memref<16x128xf32, #tpu.memory_space<vmem>>, %arg6: memref<1x128xf32, #tpu.memory_space<vmem>>, %arg7: memref<1x128xf32, #tpu.memory_space<vmem>>, %arg8: memref<8x128xf32, #tpu.memory_space<vmem>>) attributes {dimension_semantics = [#tpu.dimension_semantics<parallel>, #tpu.dimension_semantics<parallel>], iteration_bounds = array<i64: 1, 1>, scalar_prefetch = 0 : i64, scratch_operands = 0 : i64, tpu.core_type = #tpu.core_type<tc>, window_params = [{transform_indices = @transform_0, window_bounds = array<i64: 8, 128>}, {transform_indices = @transform_1, window_bounds = array<i64: 8, 16>}, {transform_indices = @transform_2, window_bounds = array<i64: 16, 128>}, {transform_indices = @transform_3, window_bounds = array<i64: 16, 128>}, {transform_indices = @transform_4, window_bounds = array<i64: 1, 128>}, {transform_indices = @transform_5, window_bounds = array<i64: 1, 128>}, {transform_indices = @transform_6, window_bounds = array<i64: 8, 128>}]} {
    %c0 = arith.constant 0 : index
    %c0_0 = arith.constant 0 : index
    %0 = vector.load %arg3[%c0, %c0_0] : memref<8x16xf32, #tpu.memory_space<vmem>>, vector<8x16xf32>
    %c0_1 = arith.constant 0 : index
    %c0_2 = arith.constant 0 : index
    %1 = vector.load %arg4[%c0_1, %c0_2] : memref<16x128xf32, #tpu.memory_space<vmem>>, vector<16x128xf32>
    %cst = arith.constant dense<0.000000e+00> : vector<8x128xf32>
    %2 = tpu.matmul %0, %1, %cst {dimension_numbers = #tpu.dot_dimension_numbers<[1], [0], [0], [1], [0, 0, 1, 1], [], []>} : vector<8x16xf32>, vector<16x128xf32>, vector<8x128xf32> -> vector<8x128xf32>
    %c0_3 = arith.constant 0 : index
    %c0_4 = arith.constant 0 : index
    %3 = vector.load %arg6[%c0_3, %c0_4] : memref<1x128xf32, #tpu.memory_space<vmem>>, vector<1x128xf32>
    %4 = vector.broadcast %3 : vector<1x128xf32> to vector<8x128xf32>
    %5 = arith.addf %2, %4 : vector<8x128xf32>
    %c0_5 = arith.constant 0 : index
    %c0_6 = arith.constant 0 : index
    %6 = vector.load %arg5[%c0_5, %c0_6] : memref<16x128xf32, #tpu.memory_space<vmem>>, vector<16x128xf32>
    %cst_7 = arith.constant dense<0.000000e+00> : vector<8x128xf32>
    %7 = tpu.matmul %0, %6, %cst_7 {dimension_numbers = #tpu.dot_dimension_numbers<[1], [0], [0], [1], [0, 0, 1, 1], [], []>} : vector<8x16xf32>, vector<16x128xf32>, vector<8x128xf32> -> vector<8x128xf32>
    %c0_8 = arith.constant 0 : index
    %c0_9 = arith.constant 0 : index
    %8 = vector.load %arg7[%c0_8, %c0_9] : memref<1x128xf32, #tpu.memory_space<vmem>>, vector<1x128xf32>
    %9 = vector.broadcast %8 : vector<1x128xf32> to vector<8x128xf32>
    %10 = arith.addf %7, %9 : vector<8x128xf32>
    %c0_10 = arith.constant 0 : index
    %c0_11 = arith.constant 0 : index
    %11 = vector.load %arg2[%c0_10, %c0_11] : memref<8x128xf32, #tpu.memory_space<vmem>>, vector<8x128xf32>
    %12 = arith.mulf %5, %11 : vector<8x128xf32>
    %13 = arith.addf %12, %10 : vector<8x128xf32>
    %c0_12 = arith.constant 0 : index
    %c0_13 = arith.constant 0 : index
    %14 = vector.load %arg8[%c0_12, %c0_13] : memref<8x128xf32, #tpu.memory_space<vmem>>, vector<8x128xf32>
    tpu.vector_store %arg8[%c0_12, %c0_13], %13 {strides = array<i32>} : memref<8x128xf32, #tpu.memory_space<vmem>>, vector<8x128xf32>,
    return
  }
  func.func @transform_0(%arg0: i32, %arg1: i32) -> (i32, i32) {
    %c0_i32 = arith.constant 0 : i32
    return %arg1, %arg0 : i32, i32
  }
  func.func @transform_1(%arg0: i32, %arg1: i32) -> (i32, i32) {
    %c0_i32 = arith.constant 0 : i32
    %c0_i32_0 = arith.constant 0 : i32
    return %arg1, %c0_i32 : i32, i32
  }
  func.func @transform_2(%arg0: i32, %arg1: i32) -> (i32, i32) {
    %c0_i32 = arith.constant 0 : i32
    %c0_i32_0 = arith.constant 0 : i32
    return %c0_i32, %arg0 : i32, i32
  }
  func.func @transform_3(%arg0: i32, %arg1: i32) -> (i32, i32) {
    %c0_i32 = arith.constant 0 : i32
    %c0_i32_0 = arith.constant 0 : i32
    return %c0_i32, %arg0 : i32, i32
  }
  func.func @transform_4(%arg0: i32, %arg1: i32) -> (i32, i32) {
    %c0_i32 = arith.constant 0 : i32
    %c0_i32_0 = arith.constant 0 : i32
    return %c0_i32, %arg0 : i32, i32
  }
  func.func @transform_5(%arg0: i32, %arg1: i32) -> (i32, i32) {
    %c0_i32 = arith.constant 0 : i32
    %c0_i32_0 = arith.constant 0 : i32
    return %c0_i32, %arg0 : i32, i32
  }
  func.func @transform_6(%arg0: i32, %arg1: i32) -> (i32, i32) {
    %c0_i32 = arith.constant 0 : i32
    return %arg1, %arg0 : i32, i32
  }
}

</mosaic_0001>

<bundles_post_ra>
// kernel: tpu_custom_call.1
= control target key start
LH: loop header
LB: loop body
LE: loop exit
PB: predicated region body
PF: predicated region fallthrough
CT: control target
= control target key end

     0   :  { %11 = vsyncpa [#allocation3], 0  ;;  %s365_s0 = inlined_call_operand.hbm [shape: f32[8,32], index: 0, kind: input, shape index: {}]   ;;  %s366_s1 = inlined_call_operand.hbm [shape: f32[8,16], index: 1, kind: input, shape index: {}]   ;;  %s367_s2 = inlined_call_operand.hbm [shape: f32[16,128], index: 2, kind: input, shape index: {}]   ;;  %s368_s3 = inlined_call_operand.hbm [shape: f32[16,128], index: 3, kind: input, shape index: {}]   ;;  %s369_s4 = inlined_call_operand.vmem [shape: f32[1,128], index: 4, kind: input, shape index: {}]   ;;  %s370_s5 = inlined_call_operand.vmem [shape: f32[1,128], index: 5, kind: input, shape index: {}]   ;;  %s371_s6 = inlined_call_operand.hbm [shape: f32[8,128], index: 6, kind: output, shape index: {}]  }
   0x1   :  { %12 = vsyncpa [#allocation6], 0 }
   0x2   :  { %13 = vsyncpa [#allocation9], 0  ;;  %s31_s23 = sshll.u32 %s366_s1, 4  ;;  %s32_s23 = int_to_ptr.hbm [resolvable:$true] %s31_s23 }
   0x3   :  { %14 = vsyncpa [#allocation4], 0  ;;  %s302_s24 = smov [#allocation5]   ;;  %s20_s28 = sshll.u32 %s365_s0, 4  ;;  %s21_s28 = int_to_ptr.hbm [resolvable:$true] %s20_s28 }
   0x4   :  { %s33_s25 = sshll.u32 %s302_s24, 4  ;;  %s303_s29 = smov [#allocation2]   ;;  %s34_s25 = int_to_ptr.vmem [resolvable:$true] %s33_s25 }
   0x5   :  { %36 = dma.hbm_to_vmem [thread:$0]  %s32_s23, 128, %s34_s25, [#allocation6]  }
   0x6   :  { %s22_s30 = sshll.u32 %s303_s29, 4  ;;  %s41_s9 = sshll.u32 %s367_s2, 4  ;;  %s23_s30 = int_to_ptr.vmem [resolvable:$true] %s22_s30  ;;  %s42_s9 = int_to_ptr.hbm [resolvable:$true] %s41_s9 }
   0x7   :  { %25 = dma.hbm_to_vmem [thread:$0]  %s21_s28, 128, %s23_s30, [#allocation3]  }
   0x8   :  { %s304_s1 = smov [#allocation7]   ;;  %s54_s13 = sshll.u32 %s368_s3, 4  ;;  %s55_s13 = int_to_ptr.hbm [resolvable:$true] %s54_s13 }
   0x9   :  { %s43_s10 = sshll.u32 %s304_s1, 4  ;;  %s305_s14 = smov 128   ;;  %s44_s10 = int_to_ptr.vmem [resolvable:$true] %s43_s10 }
   0xa   :  { %s306_s0 = smov 8   ;;  %s307_s15 = smov [#allocation8]  }
   0xb   :  { %49 = dma.hbm_to_vmem [thread:$0]  %s42_s9, 256, %s44_s10, [#allocation6], %s305_s14, %s305_s14, %s306_s0  }
   0xc   :  { %s56_s16 = sshll.u32 %s307_s15, 4  ;;  %s57_s16 = int_to_ptr.vmem [resolvable:$true] %s56_s16 }
   0xd   :  { %62 = dma.hbm_to_vmem [thread:$0]  %s55_s13, 256, %s57_s16, [#allocation9], %s305_s14, %s305_s14, %s306_s0  }
   0xe   :  { %294 = dma.done.wait [#allocation3], 128  }
   0xf   :  { %295 = vsyncadd [#allocation3], 4294967168 }
  0x10   :  { %296 = dma.done.wait [#allocation6], 384  }
  0x11   :  { %297 = vsyncadd [#allocation6], 4294966912 }
  0x12   :  { %298 = dma.done.wait [#allocation9], 256  }
  0x13   :  { %299 = vsyncadd [#allocation9], 4294967040  ;;  %v85_v0 = vld [vmem:[#allocation7 + $0x8] sm:$0xff]  ;;  %v84_v1 = vld [vmem:[#allocation7] sm:$0xff]  ;;  %vm90_vm0 = vcmask 130048   ;;  %s308_s19 = smov [#allocation10]  }
  0x14   :  { %v115_v2 = vld [vmem:[#allocation8 + $0x8] sm:$0xff]  ;;  %108 = vmatpush.msra.mxu0 %v85_v0  ;;  %v114_v4 = vld [vmem:[#allocation8] sm:$0xff]  ;;  %s149_s20 = sshll.u32 %s308_s19, 4  ;;  %s151_s23 = sshll.u32 %s371_s6, 4  ;;  %s150_s20 = int_to_ptr.vmem [resolvable:$true] %s149_s20  ;;  %s152_s23 = int_to_ptr.hbm [resolvable:$true] %s151_s23 }
  0x15   :  { %134 = vmatpush.msra.mxu1 %v115_v2  ;;  %v83_v3 = vld [vmem:[#allocation5] sm:$0xff]  ;;  %v172_v5 = vld [vmem:[%s369_s4] ss:$0 sm:$0xff] }
  0x16   :  { %109 = vmatpush.msra.mxu0 %v84_v1  ;;  %v173_v6 = vld [vmem:[%s370_s5] ss:$0 sm:$0xff] }
  0x17   :  { %135 = vmatpush.msra.mxu1 %v114_v4  ;;  %163 = vmatmul.msk.f32.vlgmr.msra.gmra.mxu0 %vm90_vm0, %v83_v3  ;;  %v140_v8 = vld [vmem:[#allocation2] sm:$0xff] }
  0x18   :  { %164 = vmatmul.msk.f32.vlgmr.msra.gmra.mxu1 %vm90_vm0, %v83_v3 }
  0x94   :  { %v111_v7 = vpop.f32.mrf.mxu0 }
  0x95   :  { %v137_v9 = vpop.f32.mrf.mxu1  ;;  %v112_v10 = vadd.f32 %v172_v5, %v111_v7 }
  0x96   :  { %v138_v11 = vadd.f32 %v173_v6, %v137_v9 }
  0x97   :  { %v141_v12 = vmul.f32 %v140_v8, %v112_v10 }
  0x99   :  { %v142_v13 = vadd.f32 %v141_v12, %v138_v11 }
  0x9b   :  { %143 = vst [vmem:[#allocation10] sm:$0xff] %v142_v13 }
  0x9c   :  { %154 = dma.vmem_to_hbm [thread:$0]  %s150_s20, 128, %s152_s23, [#allocation4]  }
  0x9d   :  { %300 = dma.done.wait [#allocation4], 128  }
  0x9e   :  { %301 = vsyncadd [#allocation4], 4294967168 }
  0x9f   :  { %159 = vsyncpa [#allocation3], 1 }
  0xa0   :  { %160 = vsyncpa [#allocation6], 1 }
  0xa1   :  { %161 = vsyncpa [#allocation9], 1 }
  0xa2   :  { %162 = vsyncpa [#allocation4], 1 }

</bundles_post_ra>
